<compile_context>
chip_gen: v5e
topology: v5e:2x2
jax: 0.10.0
libtpu: 0.0.40
codegen_flags: <defaults>
</compile_context>

<pallas_src>
import jax
import jax.numpy as jnp
from jax.experimental import pallas as pl
from jax.experimental.pallas import tpu as pltpu


# ---------------------------------------------------------------------------
# Pallas kernel: conv-as-matmul (channel-major, bias folded) + fused chain
# ---------------------------------------------------------------------------
def m1_kernel(p_ref, w_ref, o_ref):
    # p_ref : (Kdim+1, TL)    im2col patches + ones-row, HW on the lane axis
    # w_ref : (Cout, Kdim+1)  conv weight with bias as the last column
    # o_ref : (3*Cout, TL)    fused output, channel-major
    cout = w_ref.shape[0]

    # e1 = conv(x) + bias: one MXU matmul, HW stays lane-dense.
    e1 = jnp.dot(w_ref[...], p_ref[...], preferred_element_type=jnp.float32)
    # e2 = e1 + 3 ; e3 = clamp(e2, 0, 6)
    e3 = jnp.clip(e1 + 3.0, 0.0, 6.0)

    # out_j = 2*sigmoid(e1*e4_j + 8) + 2*(e1 + e4_j) + 3 per 8-channel slab of
    # e4 = cat([e1, e2, e3]); shared pieces hoisted (e2 = e1 + 3):
    s = e1 * e1
    arg0 = s + 8.0                 # e1*e1 + 8
    arg1 = arg0 + 3.0 * e1         # e1*e2 + 8 = e1*e1 + 3*e1 + 8
    arg2 = e1 * e3 + 8.0           # e1*e3 + 8
    lin0 = 4.0 * e1 + 3.0          # 2*(e1+e1) + 3
    lin1 = lin0 + 6.0              # 2*(e1+e2) + 3
    lin2 = 2.0 * (e1 + e3) + 3.0   # 2*(e1+e3) + 3

    o_ref[0 * cout:1 * cout, :] = (2.0 * jax.nn.sigmoid(arg0) + lin0).astype(o_ref.dtype)
    o_ref[1 * cout:2 * cout, :] = (2.0 * jax.nn.sigmoid(arg1) + lin1).astype(o_ref.dtype)
    o_ref[2 * cout:3 * cout, :] = (2.0 * jax.nn.sigmoid(arg2) + lin2).astype(o_ref.dtype)


# ---------------------------------------------------------------------------
# Wrapper: lane-dense im2col, bias folding, grid sizing, pallas_call
# ---------------------------------------------------------------------------
def m1_forward(x_nchw, w_oikk, bias, *, padding=3, n_blocks=None):
    N, Cin, H, W = x_nchw.shape
    Cout, _, KH, KW = w_oikk.shape
    Ho = H + 2 * padding - KH + 1
    Wo = W + 2 * padding - KW + 1
    NHW = N * Ho * Wo
    Kdim = Cin * KH * KW
    Kdim1 = Kdim + 1  # +1 for the folded bias row

    # im2col built DIRECTLY lane-dense as (Kdim, NHW): one row per
    # (cin, kh, kw) tap with the flattened (n, ho, wo) index on the lane axis.
    xp = jnp.pad(x_nchw, ((0, 0), (0, 0), (padding, padding), (padding, padding)))
    rows = [xp[:, c, kh:kh + Ho, kw:kw + Wo].reshape(1, NHW)
            for c in range(Cin) for kh in range(KH) for kw in range(KW)]
    ones = jnp.ones((1, NHW), xp.dtype)                  # bias contraction row
    patches = jnp.concatenate(rows + [ones], axis=0)      # (Kdim+1, NHW)

    # (O, I, KH, KW) -> (O, I*KH*KW) matches the (cin, kh, kw) row order above;
    # append the bias as the last contraction column.
    w_mat = jnp.concatenate(
        [w_oikk.reshape(Cout, Kdim), bias.reshape(Cout, 1)], axis=1)  # (Cout, Kdim+1)

    # Lane-axis tiling: one grid step for small problems (v5e/v6e have a single
    # TensorCore; extra steps are pure overhead), 2-way split only when there is
    # enough work per core, and a VMEM-aware cap so large problems stay safe on
    # v7x's 64 MiB VMEM without retuning.
    if n_blocks is None:
        n_blocks = 2 if NHW >= 8192 else 1
    MAX_TL = 65536  # ~2*(Kdim1+3*Cout)*MAX_TL*4B ≈ 27 MB, under scoped VMEM
    tl = pl.cdiv(NHW, n_blocks * 128) * 128
    while tl > MAX_TL:
        n_blocks += 1
        tl = pl.cdiv(NHW, n_blocks * 128) * 128
    L = n_blocks * tl
    patches = jnp.pad(patches, ((0, 0), (0, L - NHW)))

    cost = pl.CostEstimate(
        flops=2 * Cout * Kdim1 * L,
        transcendentals=3 * Cout * L,
        bytes_accessed=4 * ((Kdim1 + 3 * Cout) * L + Cout * Kdim1),
    )

    out = pl.pallas_call(
        m1_kernel,
        out_shape=jax.ShapeDtypeStruct((3 * Cout, L), jnp.float32),
        grid=(n_blocks,),
        in_specs=[
            pl.BlockSpec((Kdim1, tl), lambda i: (0, i)),
            pl.BlockSpec((Cout, Kdim1), lambda i: (0, 0)),
        ],
        out_specs=pl.BlockSpec((3 * Cout, tl), lambda i: (0, i)),
        compiler_params=pltpu.CompilerParams(
            dimension_semantics=("parallel",),
        ),
        cost_estimate=cost,
    )(patches, w_mat)

    # (24, L) -> drop lane padding -> (N, 24, Ho, Wo); already channel-major.
    out = out[:, :NHW].reshape(3 * Cout, N, Ho, Wo)
    return jnp.transpose(out, (1, 0, 2, 3))


# ---------------------------------------------------------------------------
# Pure-JAX reference (same tiled-broadcast interpretation) for validation
# ---------------------------------------------------------------------------
def m1_reference(x_nchw, w_oikk, bias, *, padding=3):
    e1 = jax.lax.conv_general_dilated(
        x_nchw, w_oikk,
        window_strides=(1, 1),
        padding=[(padding, padding), (padding, padding)],
        dimension_numbers=("NCHW", "OIHW", "NCHW"),
    ) + bias.reshape(1, -1, 1, 1)
    e2 = e1 + 3.0
    e3 = jnp.clip(e2, 0.0, 6.0)
    e4 = jnp.concatenate([e1, e2, e3], axis=1)
    e1t = jnp.concatenate([e1, e1, e1], axis=1)
    e5 = jax.nn.sigmoid(e1t * e4 + 8.0)
    e6 = e1t + e4
    e7 = e6 + e5 + 3.0
    e8 = e6 + e7
    return e5 + e8


if __name__ == "__main__":
    key = jax.random.PRNGKey(0)
    kx, kw, kb = jax.random.split(key, 3)

    # Small shapes consistent with the module: batch=2, Cin=3, spatial=16
    N, Cin, H, W = 2, 3, 16, 16
    Cout, K = 8, 3

    x = jax.random.normal(kx, (N, Cin, H, W), dtype=jnp.float32)
    fan_in = Cin * K * K
    w = jax.random.normal(kw, (Cout, Cin, K, K), dtype=jnp.float32) / jnp.sqrt(fan_in)
    b = jax.random.normal(kb, (Cout,), dtype=jnp.float32) * 0.1

    out = m1_forward(x, w, b)
    out = jax.block_until_ready(out)

    ref = m1_reference(x, w, b)
    Ho = H + 2 * 3 - K + 1
    assert out.shape == (N, 3 * Cout, Ho, Ho), out.shape
    assert jnp.allclose(out, ref, atol=1e-4, rtol=1e-4), "mismatch vs reference"

    print("KERNEL_OK")
</pallas_src>

<mosaic_0001>
module attributes {stable_mosaic.version = 11 : i64} {
  func.func @m1_kernel(%arg0: i32, %arg1: memref<28x896xf32, #tpu.memory_space<vmem>>, %arg2: memref<8x28xf32, #tpu.memory_space<vmem>>, %arg3: memref<24x896xf32, #tpu.memory_space<vmem>>) attributes {dimension_semantics = [#tpu.dimension_semantics<parallel>], iteration_bounds = array<i64: 1>, scalar_prefetch = 0 : i64, scratch_operands = 0 : i64, tpu.core_type = #tpu.core_type<tc>, window_params = [{transform_indices = @transform_0, window_bounds = array<i64: 28, 896>}, {pipeline_mode = #tpu.pipeline_mode<synchronous>, transform_indices = @transform_1, window_bounds = array<i64: 8, 28>}, {transform_indices = @transform_2, window_bounds = array<i64: 24, 896>}]} {
    %c0 = arith.constant 0 : index
    %c0_0 = arith.constant 0 : index
    %0 = vector.load %arg2[%c0, %c0_0] : memref<8x28xf32, #tpu.memory_space<vmem>>, vector<8x28xf32>
    %c0_1 = arith.constant 0 : index
    %c0_2 = arith.constant 0 : index
    %1 = vector.load %arg1[%c0_1, %c0_2] : memref<28x896xf32, #tpu.memory_space<vmem>>, vector<28x896xf32>
    %cst = arith.constant dense<0.000000e+00> : vector<8x896xf32>
    %2 = tpu.matmul %0, %1, %cst {dimension_numbers = #tpu.dot_dimension_numbers<[1], [0], [0], [1], [0, 0, 1, 1], [], []>} : vector<8x28xf32>, vector<28x896xf32>, vector<8x896xf32> -> vector<8x896xf32>
    %cst_3 = arith.constant 3.000000e+00 : f32
    %3 = vector.broadcast %cst_3 : f32 to vector<8x896xf32>
    %4 = arith.addf %2, %3 : vector<8x896xf32>
    %cst_4 = arith.constant 0.000000e+00 : f32
    %cst_5 = arith.constant 6.000000e+00 : f32
    %5 = vector.broadcast %cst_4 : f32 to vector<8x896xf32>
    %6 = arith.maximumf %5, %4 : vector<8x896xf32>
    %7 = vector.broadcast %cst_5 : f32 to vector<8x896xf32>
    %8 = arith.minimumf %7, %6 : vector<8x896xf32>
    %9 = arith.mulf %2, %2 : vector<8x896xf32>
    %cst_6 = arith.constant 8.000000e+00 : f32
    %10 = vector.broadcast %cst_6 : f32 to vector<8x896xf32>
    %11 = arith.addf %9, %10 : vector<8x896xf32>
    %cst_7 = arith.constant 3.000000e+00 : f32
    %12 = vector.broadcast %cst_7 : f32 to vector<8x896xf32>
    %13 = arith.mulf %12, %2 : vector<8x896xf32>
    %14 = arith.addf %11, %13 : vector<8x896xf32>
    %15 = arith.mulf %2, %8 : vector<8x896xf32>
    %cst_8 = arith.constant 8.000000e+00 : f32
    %16 = vector.broadcast %cst_8 : f32 to vector<8x896xf32>
    %17 = arith.addf %15, %16 : vector<8x896xf32>
    %cst_9 = arith.constant 4.000000e+00 : f32
    %18 = vector.broadcast %cst_9 : f32 to vector<8x896xf32>
    %19 = arith.mulf %18, %2 : vector<8x896xf32>
    %cst_10 = arith.constant 3.000000e+00 : f32
    %20 = vector.broadcast %cst_10 : f32 to vector<8x896xf32>
    %21 = arith.addf %19, %20 : vector<8x896xf32>
    %cst_11 = arith.constant 6.000000e+00 : f32
    %22 = vector.broadcast %cst_11 : f32 to vector<8x896xf32>
    %23 = arith.addf %21, %22 : vector<8x896xf32>
    %24 = arith.addf %2, %8 : vector<8x896xf32>
    %cst_12 = arith.constant 2.000000e+00 : f32
    %25 = vector.broadcast %cst_12 : f32 to vector<8x896xf32>
    %26 = arith.mulf %25, %24 : vector<8x896xf32>
    %cst_13 = arith.constant 3.000000e+00 : f32
    %27 = vector.broadcast %cst_13 : f32 to vector<8x896xf32>
    %28 = arith.addf %26, %27 : vector<8x896xf32>
    %29 = arith.negf %11 : vector<8x896xf32>
    %30 = math.exp %29 : vector<8x896xf32>
    %cst_14 = arith.constant 1.000000e+00 : f32
    %31 = vector.broadcast %cst_14 : f32 to vector<8x896xf32>
    %32 = arith.addf %31, %30 : vector<8x896xf32>
    %33 = arith.divf %31, %32 : vector<8x896xf32>
    %cst_15 = arith.constant 2.000000e+00 : f32
    %34 = vector.broadcast %cst_15 : f32 to vector<8x896xf32>
    %35 = arith.mulf %34, %33 : vector<8x896xf32>
    %36 = arith.addf %35, %21 : vector<8x896xf32>
    %c0_16 = arith.constant 0 : index
    %c0_17 = arith.constant 0 : index
    %37 = vector.load %arg3[%c0_16, %c0_17] : memref<24x896xf32, #tpu.memory_space<vmem>>, vector<8x896xf32>
    tpu.vector_store %arg3[%c0_16, %c0_17], %36 {strides = array<i32>} : memref<24x896xf32, #tpu.memory_space<vmem>>, vector<8x896xf32>,
    %38 = arith.negf %14 : vector<8x896xf32>
    %39 = math.exp %38 : vector<8x896xf32>
    %cst_18 = arith.constant 1.000000e+00 : f32
    %40 = vector.broadcast %cst_18 : f32 to vector<8x896xf32>
    %41 = arith.addf %40, %39 : vector<8x896xf32>
    %42 = arith.divf %40, %41 : vector<8x896xf32>
    %cst_19 = arith.constant 2.000000e+00 : f32
    %43 = vector.broadcast %cst_19 : f32 to vector<8x896xf32>
    %44 = arith.mulf %43, %42 : vector<8x896xf32>
    %45 = arith.addf %44, %23 : vector<8x896xf32>
    %c8 = arith.constant 8 : index
    %c0_20 = arith.constant 0 : index
    %46 = vector.load %arg3[%c8, %c0_20] : memref<24x896xf32, #tpu.memory_space<vmem>>, vector<8x896xf32>
    tpu.vector_store %arg3[%c8, %c0_20], %45 {strides = array<i32>} : memref<24x896xf32, #tpu.memory_space<vmem>>, vector<8x896xf32>,
    %47 = arith.negf %17 : vector<8x896xf32>
    %48 = math.exp %47 : vector<8x896xf32>
    %cst_21 = arith.constant 1.000000e+00 : f32
    %49 = vector.broadcast %cst_21 : f32 to vector<8x896xf32>
    %50 = arith.addf %49, %48 : vector<8x896xf32>
    %51 = arith.divf %49, %50 : vector<8x896xf32>
    %cst_22 = arith.constant 2.000000e+00 : f32
    %52 = vector.broadcast %cst_22 : f32 to vector<8x896xf32>
    %53 = arith.mulf %52, %51 : vector<8x896xf32>
    %54 = arith.addf %53, %28 : vector<8x896xf32>
    %c16 = arith.constant 16 : index
    %c0_23 = arith.constant 0 : index
    %55 = vector.load %arg3[%c16, %c0_23] : memref<24x896xf32, #tpu.memory_space<vmem>>, vector<8x896xf32>
    tpu.vector_store %arg3[%c16, %c0_23], %54 {strides = array<i32>} : memref<24x896xf32, #tpu.memory_space<vmem>>, vector<8x896xf32>,
    return
  }
  func.func @transform_0(%arg0: i32) -> (i32, i32) {
    %c0_i32 = arith.constant 0 : i32
    %c0_i32_0 = arith.constant 0 : i32
    return %c0_i32, %arg0 : i32, i32
  }
  func.func @transform_1(%arg0: i32) -> (i32, i32) {
    %c0_i32 = arith.constant 0 : i32
    %c0_i32_0 = arith.constant 0 : i32
    %c0_i32_1 = arith.constant 0 : i32
    return %c0_i32, %c0_i32_0 : i32, i32
  }
  func.func @transform_2(%arg0: i32) -> (i32, i32) {
    %c0_i32 = arith.constant 0 : i32
    %c0_i32_0 = arith.constant 0 : i32
    return %c0_i32, %arg0 : i32, i32
  }
}

</mosaic_0001>

<bundles_post_ra>
// kernel: tpu_custom_call.1
= control target key start
LH: loop header
LB: loop body
LE: loop exit
PB: predicated region body
PF: predicated region fallthrough
CT: control target
= control target key end

     0   :  { %7 = vsyncpa [#allocation3], 0  ;;  %s1467_s0 = inlined_call_operand.hbm [shape: f32[28,896], index: 0, kind: input, shape index: {}]   ;;  %s1468_s1 = inlined_call_operand.hbm [shape: f32[8,28], index: 1, kind: input, shape index: {}]   ;;  %s1469_s2 = inlined_call_operand.hbm [shape: f32[24,896], index: 2, kind: output, shape index: {}]  }
   0x1   :  { %8 = vsyncpa [#allocation6], 0 }
   0x2   :  { %9 = vsyncpa [#allocation4], 0  ;;  %s14_s11 = sshll.u32 %s1467_s0, 4  ;;  %s1026_s12 = smov [#allocation2]   ;;  %s15_s11 = int_to_ptr.hbm [resolvable:$true] %s14_s11 }
   0x3   :  { %s16_s13 = sshll.u32 %s1026_s12, 4  ;;  %s28_s16 = sshll.u32 %s1468_s1, 4  ;;  %s17_s13 = int_to_ptr.vmem [resolvable:$true] %s16_s13  ;;  %s29_s16 = int_to_ptr.hbm [resolvable:$true] %s28_s16 }
   0x4   :  { %s1027_s17 = smov 896   ;;  %s1028_s18 = smov 56  }
   0x5   :  { %22 = dma.hbm_to_vmem [thread:$0]  %s15_s11, 3584, %s17_s13, [#allocation3], %s1027_s17, %s1027_s17, %s1028_s18  }
   0x6   :  { %s1029_s19 = smov [#allocation5]  }
   0x7   :  { %s30_s20 = sshll.u32 %s1029_s19, 4  ;;  %s31_s20 = int_to_ptr.vmem [resolvable:$true] %s30_s20 }
   0x8   :  { %33 = dma.hbm_to_vmem [thread:$0]  %s29_s16, 128, %s31_s20, [#allocation6]  }
   0x9   :  { %1020 = dma.done.wait [#allocation3], 3584  }
   0xa   :  { %1021 = vsyncadd [#allocation3], 4294963712 }
   0xb   :  { %1022 = dma.done.wait [#allocation6], 128  }
   0xc   :  { %1023 = vsyncadd [#allocation6], 4294967168  ;;  %vm75_vm0 = vcmask 1043456   ;;  %v64_v0 = vld [vmem:[#allocation2 + $0xa8] sm:$0xf]  ;;  %v57_v4 = vld [vmem:[#allocation2 + $0x70] sm:$0xff] }
   0xd   :  { %v65_v1 = vld [vmem:[#allocation2 + $0xb0] sm:$0xf]  ;;  %v66_v2 = vld [vmem:[#allocation2 + $0xb8] sm:$0xf]  ;;  %824 = vmatpush.msk.msra.mxu0 %vm75_vm0, %v64_v0  ;;  %v67_v3 = vld [vmem:[#allocation2 + $0xc0] sm:$0xf] }
   0xe   :  { %826 = vmatpush.msk.msra.mxu1 %vm75_vm0, %v65_v1  ;;  %v58_v5 = vld [vmem:[#allocation2 + $0x78] sm:$0xff]  ;;  %828 = vmatpush.msk.msra.mxu2 %vm75_vm0, %v66_v2  ;;  %v59_v6 = vld [vmem:[#allocation2 + $0x80] sm:$0xff]  ;;  %v60_v7 = vld [vmem:[#allocation2 + $0x88] sm:$0xff]  ;;  %vm71_vm1 = vcmask 228352   ;;  %s1030_s0 = smov [#allocation7]   ;;  %s810_s23 = sshll.u32 %s1469_s2, 4  ;;  %s811_s23 = int_to_ptr.hbm [resolvable:$true] %s810_s23 }
   0xf   :  { %830 = vmatpush.msk.msra.mxu3 %vm75_vm0, %v67_v3  ;;  %v50_v8 = vld [vmem:[#allocation2 + $0x38] sm:$0xff]  ;;  %110 = vmatpush.msra.mxu0 %v57_v4  ;;  %v51_v9 = vld [vmem:[#allocation2 + $0x40] sm:$0xff]  ;;  %v52_v10 = vld [vmem:[#allocation2 + $0x48] sm:$0xff]  ;;  %s808_s1 = sshll.u32 %s1030_s0, 4  ;;  %s809_s1 = int_to_ptr.vmem [resolvable:$true] %s808_s1 }
  0x10   :  { %130 = vmatpush.msra.mxu1 %v58_v5  ;;  %v53_v11 = vld [vmem:[#allocation2 + $0x50] sm:$0xff]  ;;  %150 = vmatpush.msra.mxu2 %v59_v6  ;;  %v43_v12 = vld [vmem:[#allocation2] sm:$0xff]  ;;  %v44_v13 = vld [vmem:[#allocation2 + $0x8] sm:$0xff] }
  0x11   :  { %170 = vmatpush.msra.mxu3 %v60_v7  ;;  %111 = vmatpush.msra.mxu0 %v50_v8  ;;  %v45_v14 = vld [vmem:[#allocation2 + $0x10] sm:$0xff]  ;;  %v46_v15 = vld [vmem:[#allocation2 + $0x18] sm:$0xff]  ;;  %v42_v16 = vld [vmem:[#allocation5] sm:$0xff] }
  0x12   :  { %131 = vmatpush.msra.mxu1 %v51_v9  ;;  %151 = vmatpush.msra.mxu2 %v52_v10  ;;  %v70_v17 = vld [vmem:[#allocation2 + $0xd8] sm:$0xf]  ;;  %v68_v18 = vld [vmem:[#allocation2 + $0xc8] sm:$0xf]  ;;  %v69_v19 = vld [vmem:[#allocation2 + $0xd0] sm:$0xf] }
  0x13   :  { %171 = vmatpush.msra.mxu3 %v53_v11  ;;  %112 = vmatpush.msra.mxu0 %v43_v12  ;;  %v63_v20 = vld [vmem:[#allocation2 + $0xa0] sm:$0xff]  ;;  %v61_v21 = vld [vmem:[#allocation2 + $0x90] sm:$0xff]  ;;  %v62_v22 = vld [vmem:[#allocation2 + $0x98] sm:$0xff] }
  0x14   :  { %132 = vmatpush.msra.mxu1 %v44_v13  ;;  %152 = vmatpush.msra.mxu2 %v45_v14  ;;  %v56_v23 = vld [vmem:[#allocation2 + $0x68] sm:$0xff]  ;;  %v54_v24 = vld [vmem:[#allocation2 + $0x58] sm:$0xff]  ;;  %v55_v25 = vld [vmem:[#allocation2 + $0x60] sm:$0xff] }
  0x15   :  { %172 = vmatpush.msra.mxu3 %v46_v15  ;;  %825 = vmatmul.msk.f32.vlgmr.msra.gmra.mxu0 %vm71_vm1, %v42_v16  ;;  %v49_v26 = vld [vmem:[#allocation2 + $0x30] sm:$0xff]  ;;  %v47_v27 = vld [vmem:[#allocation2 + $0x20] sm:$0xff]  ;;  %v48_v28 = vld [vmem:[#allocation2 + $0x28] sm:$0xff] }
  0x16   :  { %827 = vmatmul.msk.f32.vlgmr.msra.gmra.mxu1 %vm71_vm1, %v42_v16  ;;  %829 = vmatmul.msk.f32.vlgmr.msra.gmra.mxu2 %vm71_vm1, %v42_v16 }
  0x17   :  { %831 = vmatmul.msk.f32.vlgmr.msra.gmra.mxu3 %vm71_vm1, %v42_v16  ;;  %836 = vmatpush.msk.msrb.mxu2 %vm75_vm0, %v70_v17 }
  0x18   :  { %832 = vmatpush.msk.msrb.mxu0 %vm75_vm0, %v68_v18  ;;  %834 = vmatpush.msk.msrb.mxu1 %vm75_vm0, %v69_v19 }
  0x19   :  { %230 = vmatpush.msrb.mxu2 %v63_v20 }
  0x1a   :  { %190 = vmatpush.msrb.mxu0 %v61_v21  ;;  %210 = vmatpush.msrb.mxu1 %v62_v22 }
  0x1b   :  { %231 = vmatpush.msrb.mxu2 %v56_v23 }
  0x1c   :  { %191 = vmatpush.msrb.mxu0 %v54_v24  ;;  %211 = vmatpush.msrb.mxu1 %v55_v25 }
  0x1d   :  { %232 = vmatpush.msrb.mxu2 %v49_v26 }
  0x1e   :  { %192 = vmatpush.msrb.mxu0 %v47_v27  ;;  %212 = vmatpush.msrb.mxu1 %v48_v28 }
  0x1f   :  { %833 = vmatmul.msk.f32.vlgmr.msrb.gmra.mxu0 %vm71_vm1, %v42_v16  ;;  %835 = vmatmul.msk.f32.vlgmr.msrb.gmra.mxu1 %vm71_vm1, %v42_v16 }
  0x20   :  { %837 = vmatmul.msk.f32.vlgmr.msrb.gmra.mxu2 %vm71_vm1, %v42_v16 }
  0x92   :  { %v114_v29 = vpop.f32.mrf.mxu0 }
  0x93   :  { %v134_v30 = vpop.f32.mrf.mxu1  ;;  %v237_v31 = vadd.f32 3.0, %v114_v29  ;;  %v258_v32 = vmul.f32 %v114_v29, %v114_v29  ;;  %v272_v33 = vmul.f32 3.0, %v114_v29  ;;  %v300_v44 = vmul.f32 4.0, %v114_v29 }
  0x94   :  { %v238_v34 = vadd.f32 3.0, %v134_v30  ;;  %v259_v35 = vmul.f32 %v134_v30, %v134_v30  ;;  %v273_v36 = vmul.f32 3.0, %v134_v30  ;;  %v301_v50 = vmul.f32 4.0, %v134_v30 }
  0x95   :  { %v244_v37 = vmax.f32 %v237_v31, 0.0  ;;  %v265_v38 = vadd.f32 8.0, %v258_v32  ;;  %v1069_v58 = vadd.f32 3.0, %v300_v44 }
  0x96   :  { %v245_v39 = vmax.f32 %v238_v34, 0.0  ;;  %v266_v40 = vadd.f32 8.0, %v259_v35  ;;  %v1071_v62 = vadd.f32 3.0, %v301_v50 }
  0x97   :  { %v251_v41 = vmin.f32 %v244_v37, 6.0  ;;  %v279_v42 = vadd.f32 %v272_v33, %v265_v38  ;;  %v838_v43 = vmul.f32 -1.442695, %v265_v38  ;;  %v1076_v6 = vadd.f32 6.0, %v1069_v58 }
  0x98   :  { %v252_v45 = vmin.f32 %v245_v39, 6.0  ;;  %v280_v46 = vadd.f32 %v273_v36, %v266_v40  ;;  %v839_v47 = vmul.f32 -1.442695, %v266_v40  ;;  %v1086_v12 = vadd.f32 6.0, %v1071_v62 }
  0x99   :  { %v286_v48 = vmul.f32 %v251_v41, %v114_v29  ;;  %864 = vpow2.f32 %v838_v43  ;;  %v845_v49 = vmul.f32 -1.442695, %v279_v42  ;;  %v154_v51 = vpop.f32.mrf.mxu2  ;;  %v321_v52 = vadd.f32 %v251_v41, %v114_v29 }
  0x9a   :  { %v287_v53 = vmul.f32 %v252_v45, %v134_v30  ;;  %866 = vpow2.f32 %v839_v47  ;;  %v846_v54 = vmul.f32 -1.442695, %v280_v46  ;;  %v239_v56 = vadd.f32 3.0, %v154_v51  ;;  %v1080_v9 = vpop.f32.mrf.mxu3 }
  0x9b   :  { %v293_v55 = vadd.f32 8.0, %v286_v48  ;;  %868 = vpow2.f32 %v845_v49  ;;  %v260_v60 = vmul.f32 %v154_v51, %v154_v51  ;;  %v328_v61 = vmul.f32 2.0, %v321_v52 }
  0x9c   :  { %v294_v57 = vadd.f32 8.0, %v287_v53  ;;  %870 = vpow2.f32 %v846_v54  ;;  %v322_v63 = vadd.f32 %v252_v45, %v134_v30  ;;  %v246_v2 = vmax.f32 %v239_v56, 0.0 }
  0x9d   :  { %v852_v59 = vmul.f32 -1.442695, %v293_v55  ;;  %v267_v8 = vadd.f32 8.0, %v260_v60  ;;  %v1082_v11 = vadd.f32 3.0, %v328_v61  ;;  %v274_v16 = vmul.f32 3.0, %v154_v51 }
  0x9e   :  { %v853_v0 = vmul.f32 -1.442695, %v294_v57  ;;  %v1088_v13 = vmul.f32 2.0, %v322_v63  ;;  %v253_v15 = vmin.f32 %v246_v2, 6.0  ;;  %v1095_v18 = vmul.f32 4.0, %v154_v51 }
  0x9f   :  { %v865_v1 = vpop.eup %864  ;;  %872 = vpow2.f32 %v852_v59  ;;  %v1098_v19 = vadd.f32 3.0, %v1080_v9  ;;  %v1102_v20 = vmul.f32 %v1080_v9, %v1080_v9  ;;  %v1107_v24 = vadd.f32 %v274_v16, %v267_v8 }
  0xa0   :  { %v867_v3 = vpop.eup %866  ;;  %v1073_v4 = vadd.f32 1.0, %v865_v1  ;;  %874 = vpow2.f32 %v853_v0  ;;  %v288_v30 = vmul.f32 %v253_v15, %v154_v51  ;;  %v1115_v31 = vadd.f32 %v253_v15, %v154_v51 }
  0xa1   :  { %v869_v5 = vpop.eup %868  ;;  %v1078_v7 = vadd.f32 1.0, %v867_v3  ;;  %v1117_v32 = vmul.f32 -1.442695, %v267_v8 }
  0xa2   :  { %v871_v10 = vpop.eup %870  ;;  %876 = vrcp.f32 %v1073_v4  ;;  %v1090_v14 = vadd.f32 1.0, %v869_v5  ;;  %v379_v22 = vand.u32 2147483647, %v1073_v4  ;;  %v381_v23 = vand.u32 2147483648, %v1073_v4 }
  0xa3   :  { %878 = vrcp.f32 %v1078_v7  ;;  %v1093_v17 = vadd.f32 1.0, %v871_v10  ;;  %v394_v26 = vand.u32 2147483647, %v1078_v7  ;;  %v396_v27 = vand.u32 2147483648, %v1078_v7 }
  0xa4   :  { %880 = vrcp.f32 %v1090_v14  ;;  %v535_v29 = vand.u32 2147483648, %v1090_v14  ;;  %vm375_vm2 = vweird.f32 %v1073_v4  ;;  %v533_v34 = vand.u32 2147483647, %v1090_v14 }
  0xa5   :  { %v873_v21 = vpop.eup %872  ;;  %882 = vrcp.f32 %v1093_v17  ;;  %vm390_vm3 = vweird.f32 %v1078_v7  ;;  %vm1124_vm4 = vcmp.eq.f32.partialorder %v379_v22, 8.507059e+37  ;;  %v382_v38 = vor.u32 1.1754944e-38, %v381_v23 }
  0xa6   :  { %v1109_v25 = vadd.f32 1.0, %v873_v21  ;;  %v875_v28 = vpop.eup %874  ;;  %v548_v40 = vand.u32 2147483647, %v1093_v17  ;;  %vm529_vm5 = vweird.f32 %v1090_v14  ;;  %vm1132_vm6 = vcmp.eq.f32.partialorder %v394_v26, 8.507059e+37 }
  0xa7   :  { %v397_v43 = vor.u32 1.1754944e-38, %v396_v27  ;;  %v550_v44 = vand.u32 2147483648, %v1093_v17  ;;  %v536_v47 = vor.u32 1.1754944e-38, %v535_v29  ;;  %v1138_v49 = vadd.f32 1.0, %v875_v28 }
  0xa8   :  { %v877_v33 = vpop.eup %876  ;;  %884 = vrcp.f32 %v1109_v25  ;;  %v689_v39 = vand.u32 2147483648, %v1109_v25  ;;  %v687_v48 = vand.u32 2147483647, %v1109_v25  ;;  %vm1141_vm8 = vcmp.eq.f32.partialorder %v533_v34, 8.507059e+37 }
  0xa9   :  { %v879_v35 = vpop.eup %878  ;;  %v371_v36 = vmul.f32 %v877_v33, %v1073_v4  ;;  %vm376_vm7 = vweird.f32 %v877_v33  ;;  %vm544_vm9 = vweird.f32 %v1093_v17  ;;  %vm1148_vm11 = vcmp.eq.f32.partialorder %v548_v40, 8.507059e+37 }
  0xaa   :  { %v386_v41 = vmul.f32 %v879_v35, %v1078_v7  ;;  %v881_v45 = vpop.eup %880  ;;  %v690_v55 = vor.u32 1.1754944e-38, %v689_v39  ;;  %886 = vrcp.f32 %v1138_v49  ;;  %vm391_vm12 = vweird.f32 %v879_v35  ;;  %vm377_vm14 = vmor %vm375_vm2, %vm376_vm7 }
  0xab   :  { %v372_v46 = vsub.f32 1.0, %v371_v36  ;;  %v883_v50 = vpop.eup %882  ;;  %v525_v51 = vmul.f32 %v881_v45, %v1090_v14  ;;  %v551_v63 = vor.u32 1.1754944e-38, %v550_v44  ;;  %vm1154_vm13 = vcmp.eq.f32.partialorder %v687_v48, 8.507059e+37  ;;  %vm392_vm1 = vmor %vm390_vm3, %vm391_vm12 }
  0xac   :  { %v387_v53 = vsub.f32 1.0, %v386_v41  ;;  %v540_v56 = vmul.f32 %v883_v50, %v1093_v17  ;;  %v295_v5 = vadd.f32 8.0, %v288_v30  ;;  %vm530_vm15 = vweird.f32 %v881_v45 }
  0xad   :  { %v373_v54 = vmul.f32 %v877_v33, %v372_v46  ;;  %v526_v60 = vsub.f32 1.0, %v525_v51  ;;  %vm545_vm0 = vweird.f32 %v883_v50  ;;  %v702_v22 = vand.u32 2147483647, %v1138_v49  ;;  %vm531_vm7 = vmor %vm529_vm5, %vm530_vm15 }
  0xae   :  { %v885_v59 = vpop.eup %884  ;;  %v388_v61 = vmul.f32 %v879_v35, %v387_v53  ;;  %v541_v3 = vsub.f32 1.0, %v540_v56  ;;  %vm698_vm2 = vweird.f32 %v1138_v49  ;;  %vm546_vm3 = vmor %vm544_vm9, %vm545_vm0  ;;  %v704_v36 = vand.u32 2147483648, %v1138_v49 }
  0xaf   :  { %v374_v0 = vadd.f32 %v877_v33, %v373_v54  ;;  %v679_v1 = vmul.f32 %v885_v59, %v1109_v25  ;;  %v527_v8 = vmul.f32 %v881_v45, %v526_v60  ;;  %vm684_vm10 = vweird.f32 %v885_v59 }
  0xb0   :  { %v389_v10 = vadd.f32 %v879_v35, %v388_v61  ;;  %v542_v21 = vmul.f32 %v883_v50, %v541_v3  ;;  %v887_v4 = vpop.eup %886  ;;  %888 = vpow2.f32 %v1117_v32  ;;  %v847_v46 = vmul.f32 -1.442695, %v1107_v24 }
  0xb1   :  { %v378_v15 = vsel %vm377_vm14, %v877_v33, %v374_v0  ;;  %v680_v16 = vsub.f32 1.0, %v679_v1  ;;  %v528_v26 = vadd.f32 %v881_v45, %v527_v8  ;;  %v854_v48 = vmul.f32 -1.442695, %v295_v5 }
  0xb2   :  { %v383_v23 = vsel %vm1124_vm4, %v382_v38, %v378_v15  ;;  %v393_v27 = vsel %vm392_vm1, %v879_v35, %v389_v10  ;;  %v543_v30 = vadd.f32 %v883_v50, %v542_v21  ;;  %v694_v35 = vmul.f32 %v887_v4, %v1138_v49 }
  0xb3   :  { %v475_v28 = vmul.f32 2.0, %v383_v23  ;;  %v681_v29 = vmul.f32 %v885_v59, %v680_v16  ;;  %v398_v7 = vsel %vm1132_vm6, %v397_v43, %v393_v27  ;;  %v532_v33 = vsel %vm531_vm7, %v881_v45, %v528_v26 }
  0xb4   :  { %v476_v34 = vmul.f32 2.0, %v398_v7  ;;  %v537_v14 = vsel %vm1141_vm8, %v536_v47, %v532_v33  ;;  %v547_v39 = vsel %vm546_vm3, %v883_v50, %v543_v30  ;;  %vm1480_vm4 = vweird.f32 %v1109_v25 }
  0xb5   :  { %v482_v37 = vadd.f32 %v475_v28, %v1069_v58  ;;  %v682_v38 = vadd.f32 %v885_v59, %v681_v29  ;;  %v629_v40 = vmul.f32 2.0, %v537_v14  ;;  %vm685_vm5 = vmor %vm1480_vm4, %vm684_vm10  ;;  %v552_v17 = vsel %vm1148_vm11, %v551_v63, %v547_v39 }
  0xb6   :  { %v483_v41 = vadd.f32 %v476_v34, %v1071_v62  ;;  %v695_v42 = vsub.f32 1.0, %v694_v35  ;;  %v630_v44 = vmul.f32 2.0, %v552_v17  ;;  %vm699_vm6 = vweird.f32 %v887_v4  ;;  %v889_v56 = vpop.eup %888 }
  0xb7   :  { %489 = vst [vmem:[#allocation7] sm:$0xff] %v482_v37  ;;  %v686_v43 = vsel %vm685_vm5, %v885_v59, %v682_v38  ;;  %v636_v58 = vadd.f32 %v629_v40, %v1076_v6  ;;  %v247_v50 = vmax.f32 %v1098_v19, 0.0  ;;  %890 = vpow2.f32 %v847_v46  ;;  %vm700_vm8 = vmor %vm698_vm2, %vm699_vm6 }
  0xb8   :  { %v691_v45 = vsel %vm1154_vm13, %v690_v55, %v686_v43  ;;  %490 = vst [vmem:[#allocation7 + $0x8] sm:$0xff] %v483_v41  ;;  %v696_v25 = vmul.f32 %v887_v4, %v695_v42  ;;  %v637_v47 = vadd.f32 %v630_v44, %v1086_v12  ;;  %v268_v32 = vadd.f32 8.0, %v1102_v20  ;;  %v1199_v55 = vpop.f32.mrf.mxu0 }
  0xb9   :  { %v783_v62 = vmul.f32 2.0, %v691_v45  ;;  %643 = vst [vmem:[#allocation7 + $0x38] sm:$0xff] %v636_v58  ;;  %v275_v6 = vmul.f32 3.0, %v1080_v9  ;;  %v705_v24 = vor.u32 1.1754944e-38, %v704_v36  ;;  %892 = vpow2.f32 %v854_v48 }
  0xba   :  { %v697_v51 = vadd.f32 %v887_v4, %v696_v25  ;;  %644 = vst [vmem:[#allocation7 + $0x40] sm:$0xff] %v637_v47  ;;  %v254_v12 = vmin.f32 %v247_v50, 6.0  ;;  %vm703_vm9 = vcmp.eq.f32.partialorder %v702_v22, 8.507059e+37  ;;  %v841_v54 = vmul.f32 -1.442695, %v268_v32 }
  0xbb   :  { %v790_v52 = vadd.f32 %v783_v62, %v1082_v11  ;;  %v282_v19 = vadd.f32 %v275_v6, %v268_v32  ;;  %v336_v20 = vadd.f32 3.0, %v1088_v13  ;;  %v303_v59 = vmul.f32 4.0, %v1080_v9 }
  0xbc   :  { %v701_v53 = vsel %vm700_vm8, %v887_v4, %v697_v51  ;;  %v289_v11 = vmul.f32 %v254_v12, %v1080_v9  ;;  %v1204_v60 = vadd.f32 1.0, %v889_v56  ;;  %894 = vpow2.f32 %v841_v54 }
  0xbd   :  { %797 = vst [vmem:[#allocation7 + $0x70] sm:$0xff] %v790_v52  ;;  %v706_v57 = vsel %vm703_vm9, %v705_v24, %v701_v53  ;;  %v848_v61 = vmul.f32 -1.442695, %v282_v19  ;;  %v241_v0 = vadd.f32 3.0, %v1199_v55  ;;  %v891_v1 = vpop.eup %890  ;;  %v1208_v3 = vadd.f32 3.0, %v1095_v18 }
  0xbe   :  { %v784_v49 = vmul.f32 2.0, %v706_v57  ;;  %v296_v63 = vadd.f32 8.0, %v289_v11  ;;  %v330_v13 = vmul.f32 2.0, %v1115_v31  ;;  %896 = vrcp.f32 %v1204_v60 }
  0xbf   :  { %v893_v5 = vpop.eup %892  ;;  %v1212_v8 = vadd.f32 1.0, %v891_v1  ;;  %v1214_v10 = vadd.f32 3.0, %v303_v59  ;;  %898 = vpow2.f32 %v848_v61  ;;  %v324_v16 = vadd.f32 %v254_v12, %v1080_v9 }
  0xc0   :  { %v791_v2 = vadd.f32 %v784_v49, %v336_v20  ;;  %v1216_v15 = vadd.f32 1.0, %v893_v5  ;;  %v855_v21 = vmul.f32 -1.442695, %v296_v63  ;;  %v409_v22 = vand.u32 2147483647, %v1204_v60 }
  0xc1   :  { %900 = vrcp.f32 %v1212_v8  ;;  %v248_v18 = vmax.f32 %v241_v0, 0.0  ;;  %v1222_v23 = vadd.f32 6.0, %v1208_v3  ;;  %v1224_v26 = vadd.f32 3.0, %v330_v13 }
  0xc2   :  { %798 = vst [vmem:[#allocation7 + $0x78] sm:$0xff] %v791_v2  ;;  %v895_v31 = vpop.eup %894  ;;  %v411_v27 = vand.u32 2147483648, %v1204_v60  ;;  %902 = vrcp.f32 %v1216_v15  ;;  %v565_v4 = vand.u32 2147483648, %v1212_v8  ;;  %v1230_v9 = vadd.f32 6.0, %v1214_v10 }
  0xc3   :  { %v1232_v28 = vadd.f32 1.0, %v895_v31  ;;  %904 = vpow2.f32 %v855_v21  ;;  %vm405_vm10 = vweird.f32 %v1204_v60  ;;  %v563_v7 = vand.u32 2147483647, %v1212_v8 }
  0xc4   :  { %v897_v29 = vpop.eup %896  ;;  %v719_v30 = vand.u32 2147483648, %v1216_v15  ;;  %v1237_v33 = vmul.f32 2.0, %v324_v16  ;;  %vm1240_vm11 = vcmp.eq.f32.partialorder %v409_v22, 8.507059e+37  ;;  %v717_v37 = vand.u32 2147483647, %v1216_v15 }
  0xc5   :  { %v899_v34 = vpop.eup %898  ;;  %v401_v35 = vmul.f32 %v897_v29, %v1204_v60  ;;  %906 = vrcp.f32 %v1232_v28  ;;  %v1246_v14 = vmin.f32 %v248_v18, 6.0  ;;  %v412_v38 = vor.u32 1.1754944e-38, %v411_v27 }
  0xc6   :  { %vm559_vm12 = vweird.f32 %v1212_v8  ;;  %v1249_v39 = vadd.f32 1.0, %v899_v34  ;;  %v262_v40 = vmul.f32 %v1199_v55, %v1199_v55  ;;  %vm406_vm13 = vweird.f32 %v897_v29 }
  0xc7   :  { %v901_v41 = vpop.eup %900  ;;  %v402_v17 = vsub.f32 1.0, %v401_v35  ;;  %v566_v42 = vor.u32 1.1754944e-38, %v565_v4  ;;  %vm713_vm14 = vweird.f32 %v1216_v15  ;;  %v276_v43 = vmul.f32 3.0, %v1199_v55  ;;  %vm407_vm7 = vmor %vm405_vm10, %vm406_vm13 }
  0xc8   :  { %v903_v44 = vpop.eup %902  ;;  %v555_v58 = vmul.f32 %v901_v41, %v1212_v8  ;;  %vm1256_vm15 = vcmp.eq.f32.partialorder %v563_v7, 8.507059e+37  ;;  %v720_v25 = vor.u32 1.1754944e-38, %v719_v30  ;;  %v424_v46 = vand.u32 2147483647, %v1232_v28 }
  0xc9   :  { %v426_v62 = vand.u32 2147483648, %v1232_v28  ;;  %v905_v47 = vpop.eup %904  ;;  %v403_v48 = vmul.f32 %v897_v29, %v402_v17  ;;  %v709_v50 = vmul.f32 %v903_v44, %v1216_v15  ;;  %vm1263_vm0 = vcmp.eq.f32.partialorder %v717_v37, 8.507059e+37 }
  0xca   :  { %vm420_vm1 = vweird.f32 %v1232_v28  ;;  %908 = vrcp.f32 %v1249_v39  ;;  %v556_v32 = vsub.f32 1.0, %v555_v58  ;;  %v1269_v6 = vadd.f32 8.0, %v262_v40 }
  0xcb   :  { %v290_v52 = vmul.f32 %v1246_v14, %v1199_v55  ;;  %v1274_v24 = vmul.f32 4.0, %v1199_v55  ;;  %v907_v12 = vpop.eup %906  ;;  %v404_v53 = vadd.f32 %v897_v29, %v403_v48  ;;  %vm560_vm2 = vweird.f32 %v901_v41 }
  0xcc   :  { %v710_v19 = vsub.f32 1.0, %v709_v50  ;;  %v1276_v54 = vadd.f32 1.0, %v905_v47  ;;  %v557_v56 = vmul.f32 %v901_v41, %v556_v32  ;;  %vm714_vm3 = vweird.f32 %v903_v44  ;;  %vm561_vm6 = vmor %vm559_vm12, %vm560_vm2 }
  0xcd   :  { %v416_v20 = vmul.f32 %v907_v12, %v1232_v28  ;;  %vm1282_vm4 = vcmp.eq.f32.partialorder %v424_v46, 8.507059e+37  ;;  %v427_v11 = vor.u32 1.1754944e-38, %v426_v62  ;;  %v408_v59 = vsel %vm407_vm7, %v897_v29, %v404_v53  ;;  %vm715_vm8 = vmor %vm713_vm14, %vm714_vm3 }
  0xce   :  { %v711_v49 = vmul.f32 %v903_v44, %v710_v19  ;;  %v578_v61 = vand.u32 2147483647, %v1249_v39  ;;  %910 = vrcp.f32 %v1276_v54  ;;  %v413_v63 = vsel %vm1240_vm11, %v412_v38, %v408_v59 }
  0xcf   :  { %v558_v60 = vadd.f32 %v901_v41, %v557_v56  ;;  %v417_v0 = vsub.f32 1.0, %v416_v20  ;;  %vm574_vm5 = vweird.f32 %v1249_v39  ;;  %v477_v2 = vmul.f32 2.0, %v413_v63 }
  0xd0   :  { %v909_v1 = vpop.eup %908  ;;  %v712_v13 = vadd.f32 %v903_v44, %v711_v49  ;;  %v580_v5 = vand.u32 2147483648, %v1249_v39  ;;  %v283_v16 = vadd.f32 %v276_v43, %v1269_v6  ;;  %vm421_vm9 = vweird.f32 %v907_v12 }
  0xd1   :  { %v562_v21 = vsel %vm561_vm6, %v901_v41, %v558_v60  ;;  %v418_v22 = vmul.f32 %v907_v12, %v417_v0  ;;  %v570_v18 = vmul.f32 %v909_v1, %v1249_v39  ;;  %v484_v31 = vadd.f32 %v477_v2, %v1208_v3  ;;  %vm422_vm11 = vmor %vm420_vm1, %vm421_vm9  ;;  %v1314_v41 = vpop.f32.mrf.mxu1 }
  0xd2   :  { %v567_v8 = vsel %vm1256_vm15, %v566_v42, %v562_v21  ;;  %v716_v27 = vsel %vm715_vm8, %v903_v44, %v712_v13  ;;  %vm1303_vm10 = vcmp.eq.f32.partialorder %v578_v61, 8.507059e+37  ;;  %vm575_vm12 = vweird.f32 %v909_v1  ;;  %v1338_v61 = vpop.f32.mrf.mxu2 }
  0xd3   :  { %v631_v29 = vmul.f32 2.0, %v567_v8  ;;  %v721_v7 = vsel %vm1263_vm0, %v720_v25, %v716_v27  ;;  %v419_v15 = vadd.f32 %v907_v12, %v418_v22  ;;  %v571_v30 = vsub.f32 1.0, %v570_v18  ;;  %491 = vst [vmem:[#allocation7 + $0x10] sm:$0xff] %v484_v31  ;;  %vm576_vm14 = vmor %vm574_vm5, %vm575_vm12 }
  0xd4   :  { %v911_v34 = vpop.eup %910  ;;  %v785_v35 = vmul.f32 2.0, %v721_v7  ;;  %v581_v3 = vor.u32 1.1754944e-38, %v580_v5  ;;  %vm728_vm13 = vweird.f32 %v1276_v54  ;;  %v732_v28 = vand.u32 2147483647, %v1276_v54 }
  0xd5   :  { %v638_v36 = vadd.f32 %v631_v29, %v1222_v23  ;;  %v423_v37 = vsel %vm422_vm11, %v907_v12, %v419_v15  ;;  %v572_v38 = vmul.f32 %v909_v1, %v571_v30  ;;  %v724_v40 = vmul.f32 %v911_v34, %v1276_v54 }
  0xd6   :  { %v792_v17 = vadd.f32 %v785_v35, %v1224_v26  ;;  %v428_v42 = vsel %vm1282_vm4, %v427_v11, %v423_v37  ;;  %v297_v43 = vadd.f32 8.0, %v290_v52  ;;  %v734_v23 = vand.u32 2147483648, %v1276_v54 }
  0xd7   :  { %645 = vst [vmem:[#allocation7 + $0x48] sm:$0xff] %v638_v36  ;;  %v478_v44 = vmul.f32 2.0, %v428_v42  ;;  %v573_v58 = vadd.f32 %v909_v1, %v572_v38  ;;  %v725_v45 = vsub.f32 1.0, %v724_v40  ;;  %v842_v25 = vmul.f32 -1.442695, %v1269_v6 }
  0xd8   :  { %799 = vst [vmem:[#allocation7 + $0x80] sm:$0xff] %v792_v17  ;;  %v849_v26 = vmul.f32 -1.442695, %v283_v16  ;;  %v242_v46 = vadd.f32 3.0, %v1314_v41  ;;  %v263_v62 = vmul.f32 %v1314_v41, %v1314_v41  ;;  %vm729_vm15 = vweird.f32 %v911_v34 }
  0xd9   :  { %v485_v47 = vadd.f32 %v478_v44, %v1214_v10  ;;  %v577_v48 = vsel %vm576_vm14, %v909_v1, %v573_v58  ;;  %v726_v50 = vmul.f32 %v911_v34, %v725_v45  ;;  %912 = vpow2.f32 %v842_v25  ;;  %vm730_vm0 = vmor %vm728_vm13, %vm729_vm15 }
  0xda   :  { %v582_v51 = vsel %vm1303_vm10, %v581_v3, %v577_v48  ;;  %v856_v32 = vmul.f32 -1.442695, %v297_v43  ;;  %v249_v39 = vmax.f32 %v242_v46, 0.0  ;;  %v735_v12 = vor.u32 1.1754944e-38, %v734_v23 }
  0xdb   :  { %492 = vst [vmem:[#allocation7 + $0x18] sm:$0xff] %v485_v47  ;;  %v632_v52 = vmul.f32 2.0, %v582_v51  ;;  %v727_v6 = vadd.f32 %v911_v34, %v726_v50  ;;  %914 = vpow2.f32 %v849_v26  ;;  %v270_v10 = vadd.f32 8.0, %v263_v62 }
  0xdc   :  { %916 = vpow2.f32 %v856_v32  ;;  %v256_v53 = vmin.f32 %v249_v39, 6.0  ;;  %v277_v19 = vmul.f32 3.0, %v1314_v41  ;;  %vm733_vm1 = vcmp.eq.f32.partialorder %v732_v28, 8.507059e+37 }
  0xdd   :  { %v639_v56 = vadd.f32 %v632_v52, %v1230_v9  ;;  %v731_v20 = vsel %vm730_vm0, %v911_v34, %v727_v6  ;;  %v325_v11 = vadd.f32 %v1246_v14, %v1199_v55  ;;  %v338_v54 = vadd.f32 3.0, %v1237_v33 }
  0xde   :  { %v736_v57 = vsel %vm733_vm1, %v735_v12, %v731_v20  ;;  %v284_v59 = vadd.f32 %v277_v19, %v270_v10  ;;  %v291_v49 = vmul.f32 %v256_v53, %v1314_v41  ;;  %v843_v60 = vmul.f32 -1.442695, %v270_v10 }
  0xdf   :  { %646 = vst [vmem:[#allocation7 + $0x50] sm:$0xff] %v639_v56  ;;  %v786_v63 = vmul.f32 2.0, %v736_v57  ;;  %v913_v0 = vpop.eup %912  ;;  %v1342_v1 = vadd.f32 3.0, %v1274_v24  ;;  %v243_v55 = vadd.f32 3.0, %v1338_v61  ;;  %v332_v21 = vmul.f32 2.0, %v325_v11 }
  0xe0   :  { %v298_v9 = vadd.f32 8.0, %v291_v49  ;;  %v850_v2 = vmul.f32 -1.442695, %v284_v59  ;;  %v1344_v16 = vadd.f32 1.0, %v913_v0  ;;  %918 = vpow2.f32 %v843_v60 }
  0xe1   :  { %v915_v13 = vpop.eup %914  ;;  %v793_v5 = vadd.f32 %v786_v63, %v338_v54  ;;  %v305_v24 = vmul.f32 4.0, %v1314_v41  ;;  %v1353_v18 = vadd.f32 6.0, %v1342_v1  ;;  %v250_v8 = vmax.f32 %v243_v55, 0.0 }
  0xe2   :  { %v917_v14 = vpop.eup %916  ;;  %v1347_v22 = vadd.f32 1.0, %v915_v13  ;;  %920 = vpow2.f32 %v850_v2  ;;  %v857_v33 = vmul.f32 -1.442695, %v298_v9  ;;  %v1357_v27 = vadd.f32 3.0, %v332_v21 }
  0xe3   :  { %800 = vst [vmem:[#allocation7 + $0x88] sm:$0xff] %v793_v5  ;;  %922 = vrcp.f32 %v1344_v16  ;;  %v1355_v31 = vadd.f32 1.0, %v917_v14  ;;  %v439_v4 = vand.u32 2147483647, %v1344_v16  ;;  %v441_v29 = vand.u32 2147483648, %v1344_v16 }
  0xe4   :  { %924 = vrcp.f32 %v1347_v22  ;;  %v593_v15 = vand.u32 2147483647, %v1347_v22  ;;  %v595_v30 = vand.u32 2147483648, %v1347_v22  ;;  %v264_v34 = vmul.f32 %v1338_v61, %v1338_v61 }
  0xe5   :  { %926 = vpow2.f32 %v857_v33  ;;  %vm435_vm2 = vweird.f32 %v1344_v16  ;;  %v1367_v3 = vadd.f32 3.0, %v305_v24  ;;  %v1370_v36 = vadd.f32 %v256_v53, %v1314_v41 }
  0xe6   :  { %v919_v7 = vpop.eup %918  ;;  %928 = vrcp.f32 %v1355_v31  ;;  %vm589_vm7 = vweird.f32 %v1347_v22  ;;  %v749_v40 = vand.u32 2147483648, %v1355_v31  ;;  %v1378_v42 = vmin.f32 %v250_v8, 6.0 }
  0xe7   :  { %v1372_v37 = vadd.f32 1.0, %v919_v7  ;;  %vm1381_vm3 = vcmp.eq.f32.partialorder %v439_v4, 8.507059e+37  ;;  %v442_v41 = vor.u32 1.1754944e-38, %v441_v29  ;;  %v747_v58 = vand.u32 2147483647, %v1355_v31 }
  0xe8   :  { %v921_v35 = vpop.eup %920  ;;  %vm1388_vm4 = vcmp.eq.f32.partialorder %v593_v15, 8.507059e+37  ;;  %v596_v25 = vor.u32 1.1754944e-38, %v595_v30  ;;  %v1392_v26 = vadd.f32 8.0, %v264_v34  ;;  %vm743_vm5 = vweird.f32 %v1355_v31 }
  0xe9   :  { %v923_v38 = vpop.eup %922  ;;  %v1376_v17 = vadd.f32 1.0, %v921_v35  ;;  %930 = vrcp.f32 %v1372_v37  ;;  %v278_v47 = vmul.f32 3.0, %v1338_v61  ;;  %v750_v51 = vor.u32 1.1754944e-38, %v749_v40 }
  0xea   :  { %v925_v28 = vpop.eup %924  ;;  %v431_v43 = vmul.f32 %v923_v38, %v1344_v16  ;;  %v454_v32 = vand.u32 2147483647, %v1372_v37  ;;  %v292_v39 = vmul.f32 %v1378_v42, %v1338_v61  ;;  %vm436_vm6 = vweird.f32 %v923_v38 }
  0xeb   :  { %v585_v45 = vmul.f32 %v925_v28, %v1347_v22  ;;  %v927_v46 = vpop.eup %926  ;;  %932 = vrcp.f32 %v1376_v17  ;;  %vm1401_vm8 = vcmp.eq.f32.partialorder %v747_v58, 8.507059e+37  ;;  %v456_v53 = vand.u32 2147483648, %v1372_v37  ;;  %vm437_vm11 = vmor %vm435_vm2, %vm436_vm6 }
  0xec   :  { %v432_v62 = vsub.f32 1.0, %v431_v43  ;;  %v929_v48 = vpop.eup %928  ;;  %vm590_vm9 = vweird.f32 %v925_v28  ;;  %v608_v19 = vand.u32 2147483647, %v1376_v17  ;;  %v1407_v56 = vadd.f32 1.0, %v927_v46 }
  0xed   :  { %v586_v50 = vsub.f32 1.0, %v585_v45  ;;  %v739_v6 = vmul.f32 %v929_v48, %v1355_v31  ;;  %vm450_vm10 = vweird.f32 %v1372_v37  ;;  %v610_v59 = vand.u32 2147483648, %v1376_v17  ;;  %vm591_vm14 = vmor %vm589_vm7, %vm590_vm9 }
  0xee   :  { %v433_v52 = vmul.f32 %v923_v38, %v432_v62  ;;  %vm1414_vm12 = vcmp.eq.f32.partialorder %v454_v32, 8.507059e+37  ;;  %vm604_vm13 = vweird.f32 %v1376_v17  ;;  %934 = vrcp.f32 %v1407_v56 }
  0xef   :  { %v587_v10 = vmul.f32 %v925_v28, %v586_v50  ;;  %v931_v20 = vpop.eup %930  ;;  %v740_v11 = vsub.f32 1.0, %v739_v6  ;;  %vm744_vm15 = vweird.f32 %v929_v48  ;;  %v457_v2 = vor.u32 1.1754944e-38, %v456_v53 }
  0xf0   :  { %v434_v57 = vadd.f32 %v923_v38, %v433_v52  ;;  %v446_v54 = vmul.f32 %v931_v20, %v1372_v37  ;;  %vm1426_vm0 = vcmp.eq.f32.partialorder %v608_v19, 8.507059e+37  ;;  %v611_v24 = vor.u32 1.1754944e-38, %v610_v59  ;;  %vm745_vm1 = vmor %vm743_vm5, %vm744_vm15 }
  0xf1   :  { %v588_v49 = vadd.f32 %v925_v28, %v587_v10  ;;  %v933_v60 = vpop.eup %932  ;;  %v741_v9 = vmul.f32 %v929_v48, %v740_v11  ;;  %vm451_vm2 = vweird.f32 %v931_v20  ;;  %v285_v30 = vadd.f32 %v278_v47, %v1392_v26 }
  0xf2   :  { %v438_v0 = vsel %vm437_vm11, %v923_v38, %v434_v57  ;;  %v447_v16 = vsub.f32 1.0, %v446_v54  ;;  %v600_v55 = vmul.f32 %v933_v60, %v1376_v17  ;;  %vm605_vm7 = vweird.f32 %v933_v60 }
  0xf3   :  { %v443_v13 = vsel %vm1381_vm3, %v442_v41, %v438_v0  ;;  %v592_v5 = vsel %vm591_vm14, %v925_v28, %v588_v49  ;;  %v742_v22 = vadd.f32 %v929_v48, %v741_v9  ;;  %vm452_vm3 = vmor %vm450_vm10, %vm451_vm2  ;;  %v299_v44 = vadd.f32 8.0, %v292_v39 }
  0xf4   :  { %v479_v21 = vmul.f32 2.0, %v443_v13  ;;  %v597_v33 = vsel %vm1388_vm4, %v596_v25, %v592_v5  ;;  %v448_v4 = vmul.f32 %v931_v20, %v447_v16  ;;  %v601_v29 = vsub.f32 1.0, %v600_v55  ;;  %v935_v34 = vpop.eup %934  ;;  %vm606_vm4 = vmor %vm604_vm13, %vm605_vm7 }
  0xf5   :  { %v633_v8 = vmul.f32 2.0, %v597_v33  ;;  %v746_v15 = vsel %vm745_vm1, %v929_v48, %v742_v22  ;;  %v754_v43 = vmul.f32 %v935_v34, %v1407_v56  ;;  %v844_v45 = vmul.f32 -1.442695, %v1392_v26 }
  0xf6   :  { %v486_v7 = vadd.f32 %v479_v21, %v1342_v1  ;;  %v751_v38 = vsel %vm1401_vm8, %v750_v51, %v746_v15  ;;  %v449_v40 = vadd.f32 %v931_v20, %v448_v4  ;;  %v602_v28 = vmul.f32 %v933_v60, %v601_v29 }
  0xf7   :  { %v640_v35 = vadd.f32 %v633_v8, %v1353_v18  ;;  %v787_v31 = vmul.f32 2.0, %v751_v38  ;;  %v762_v1 = vand.u32 2147483647, %v1407_v56  ;;  %v764_v18 = vand.u32 2147483648, %v1407_v56 }
  0xf8   :  { %493 = vst [vmem:[#allocation7 + $0x20] sm:$0xff] %v486_v7  ;;  %v453_v41 = vsel %vm452_vm3, %v931_v20, %v449_v40  ;;  %v603_v58 = vadd.f32 %v933_v60, %v602_v28  ;;  %v755_v37 = vsub.f32 1.0, %v754_v43  ;;  %v851_v46 = vmul.f32 -1.442695, %v285_v30 }
  0xf9   :  { %647 = vst [vmem:[#allocation7 + $0x58] sm:$0xff] %v640_v35  ;;  %v794_v23 = vadd.f32 %v787_v31, %v1357_v27  ;;  %v458_v25 = vsel %vm1414_vm12, %v457_v2, %v453_v41  ;;  %vm759_vm5 = vweird.f32 %v935_v34  ;;  %936 = vpow2.f32 %v844_v45 }
  0xfa   :  { %v480_v62 = vmul.f32 2.0, %v458_v25  ;;  %v607_v47 = vsel %vm606_vm4, %v933_v60, %v603_v58  ;;  %v756_v26 = vmul.f32 %v935_v34, %v755_v37  ;;  %938 = vpow2.f32 %v851_v46 }
  0xfb   :  { %801 = vst [vmem:[#allocation7 + $0x90] sm:$0xff] %v794_v23  ;;  %v612_v48 = vsel %vm1426_vm0, %v611_v24, %v607_v47  ;;  %v858_v27 = vmul.f32 -1.442695, %v299_v44  ;;  %v319_v50 = vadd.f32 6.0, %v1367_v3  ;;  %v333_v17 = vmul.f32 2.0, %v1370_v36 }
  0xfc   :  { %v487_v51 = vadd.f32 %v480_v62, %v1367_v3  ;;  %v634_v32 = vmul.f32 2.0, %v612_v48  ;;  %v757_v39 = vadd.f32 %v935_v34, %v756_v26  ;;  %vm758_vm6 = vweird.f32 %v1407_v56 }
  0xfd   :  { %940 = vpow2.f32 %v858_v27  ;;  %vm760_vm8 = vmor %vm758_vm6, %vm759_vm5  ;;  %v765_v6 = vor.u32 1.1754944e-38, %v764_v18  ;;  %vm763_vm9 = vcmp.eq.f32.partialorder %v762_v1, 8.507059e+37  ;;  %v340_v20 = vadd.f32 3.0, %v333_v17 }
  0xfe   :  { %494 = vst [vmem:[#allocation7 + $0x28] sm:$0xff] %v487_v51  ;;  %v641_v52 = vadd.f32 %v634_v32, %v319_v50  ;;  %v761_v12 = vsel %vm760_vm8, %v935_v34, %v757_v39  ;;  %v306_v63 = vmul.f32 4.0, %v1338_v61  ;;  %v327_v5 = vadd.f32 %v1378_v42, %v1338_v61 }
  0xff   :  { %v937_v53 = vpop.eup %936  ;;  %v766_v10 = vsel %vm763_vm9, %v765_v6, %v761_v12 }
 0x100   :  { %648 = vst [vmem:[#allocation7 + $0x60] sm:$0xff] %v641_v52  ;;  %v939_v19 = vpop.eup %938  ;;  %v788_v3 = vmul.f32 2.0, %v766_v10  ;;  %v369_v57 = vadd.f32 1.0, %v937_v53  ;;  %v313_v21 = vadd.f32 3.0, %v306_v63  ;;  %v334_v38 = vmul.f32 2.0, %v327_v5 }
 0x101   :  { %v523_v11 = vadd.f32 1.0, %v939_v19 }
 0x102   :  { %v795_v59 = vadd.f32 %v788_v3, %v340_v20  ;;  %942 = vrcp.f32 %v369_v57  ;;  %v469_v2 = vand.u32 2147483647, %v369_v57  ;;  %v471_v16 = vand.u32 2147483648, %v369_v57 }
 0x103   :  { %v941_v36 = vpop.eup %940  ;;  %944 = vrcp.f32 %v523_v11  ;;  %v625_v14 = vand.u32 2147483648, %v523_v11  ;;  %vm465_vm11 = vweird.f32 %v369_v57  ;;  %v623_v8 = vand.u32 2147483647, %v523_v11 }
 0x104   :  { %802 = vst [vmem:[#allocation7 + $0x98] sm:$0xff] %v795_v59  ;;  %v677_v56 = vadd.f32 1.0, %v941_v36  ;;  %vm470_vm13 = vcmp.eq.f32.partialorder %v469_v2, 8.507059e+37  ;;  %vm619_vm14 = vweird.f32 %v523_v11  ;;  %v472_v7 = vor.u32 1.1754944e-38, %v471_v16 }
 0x105   :  { %v626_v30 = vor.u32 1.1754944e-38, %v625_v14  ;;  %vm624_vm2 = vcmp.eq.f32.partialorder %v623_v8, 8.507059e+37  ;;  %v320_v44 = vadd.f32 6.0, %v313_v21  ;;  %v341_v37 = vadd.f32 3.0, %v334_v38 }
 0x106   :  { %946 = vrcp.f32 %v677_v56  ;;  %v779_v61 = vand.u32 2147483648, %v677_v56  ;;  %v777_v35 = vand.u32 2147483647, %v677_v56  ;;  %vm773_vm7 = vweird.f32 %v677_v56 }
 0x108   :  { %v943_v49 = vpop.eup %942  ;;  %v780_v58 = vor.u32 1.1754944e-38, %v779_v61  ;;  %vm778_vm4 = vcmp.eq.f32.partialorder %v777_v35, 8.507059e+37 }
 0x109   :  { %v945_v54 = vpop.eup %944  ;;  %v461_v60 = vmul.f32 %v943_v49, %v369_v57  ;;  %vm466_vm10 = vweird.f32 %v943_v49 }
 0x10a   :  { %v615_v0 = vmul.f32 %v945_v54, %v523_v11  ;;  %vm620_vm12 = vweird.f32 %v945_v54  ;;  %vm467_vm15 = vmor %vm465_vm11, %vm466_vm10 }
 0x10b   :  { %v462_v9 = vsub.f32 1.0, %v461_v60  ;;  %vm621_vm0 = vmor %vm619_vm14, %vm620_vm12 }
 0x10c   :  { %v947_v13 = vpop.eup %946  ;;  %v616_v55 = vsub.f32 1.0, %v615_v0 }
 0x10d   :  { %v463_v33 = vmul.f32 %v943_v49, %v462_v9  ;;  %v769_v22 = vmul.f32 %v947_v13, %v677_v56  ;;  %vm774_vm1 = vweird.f32 %v947_v13 }
 0x10e   :  { %v617_v24 = vmul.f32 %v945_v54, %v616_v55  ;;  %vm775_vm3 = vmor %vm773_vm7, %vm774_vm1 }
 0x10f   :  { %v464_v4 = vadd.f32 %v943_v49, %v463_v33  ;;  %v770_v29 = vsub.f32 1.0, %v769_v22 }
 0x110   :  { %v618_v15 = vadd.f32 %v945_v54, %v617_v24 }
 0x111   :  { %v468_v42 = vsel %vm467_vm15, %v943_v49, %v464_v4  ;;  %v771_v34 = vmul.f32 %v947_v13, %v770_v29 }
 0x112   :  { %v473_v40 = vsel %vm470_vm13, %v472_v7, %v468_v42  ;;  %v622_v28 = vsel %vm621_vm0, %v945_v54, %v618_v15 }
 0x113   :  { %v481_v31 = vmul.f32 2.0, %v473_v40  ;;  %v627_v43 = vsel %vm624_vm2, %v626_v30, %v622_v28  ;;  %v772_v1 = vadd.f32 %v947_v13, %v771_v34 }
 0x114   :  { %v635_v41 = vmul.f32 2.0, %v627_v43 }
 0x115   :  { %v488_v18 = vadd.f32 %v481_v31, %v313_v21  ;;  %v776_v45 = vsel %vm775_vm3, %v947_v13, %v772_v1 }
 0x116   :  { %v642_v23 = vadd.f32 %v635_v41, %v320_v44  ;;  %v781_v25 = vsel %vm778_vm4, %v780_v58, %v776_v45 }
 0x117   :  { %495 = vst [vmem:[#allocation7 + $0x30] sm:$0xff] %v488_v18  ;;  %v789_v46 = vmul.f32 2.0, %v781_v25 }
 0x118   :  { %649 = vst [vmem:[#allocation7 + $0x68] sm:$0xff] %v642_v23 }
 0x119   :  { %v796_v62 = vadd.f32 %v789_v46, %v341_v37 }
 0x11b   :  { %803 = vst [vmem:[#allocation7 + $0xa0] sm:$0xff] %v796_v62 }
 0x11c   :  { %816 = dma.vmem_to_hbm [thread:$0]  %s809_s1, 2688, %s811_s23, [#allocation4], %s1027_s17, %s1027_s17, %s1028_s18  }
 0x11d   :  { %1024 = dma.done.wait [#allocation4], 2688  }
 0x11e   :  { %1025 = vsyncadd [#allocation4], 4294964608 }
 0x11f   :  { %821 = vsyncpa [#allocation3], 1 }
 0x120   :  { %822 = vsyncpa [#allocation6], 1 }
 0x121   :  { %823 = vsyncpa [#allocation4], 1 }

</bundles_post_ra>
